<compile_context>
chip_gen: v7x
topology: tpu7x:2x2x1
jax: 0.10.0
libtpu: 0.0.40
codegen_flags: <defaults>
</compile_context>

<pallas_src>
import functools
import math

import jax
import jax.numpy as jnp
from jax import lax
from jax.experimental import pallas as pl
from jax.experimental.pallas import tpu as pltpu

# keep the pure-JAX reference matmuls at f32 accuracy so it is comparable with
# the f32-accumulating Pallas kernels
jax.config.update("jax_default_matmul_precision", "highest")


# ----------------------------------------------------------------------------
# Pallas kernel: linear layer  out = x @ w + b   (row-tiled)
# ----------------------------------------------------------------------------
def _linear_kernel(x_ref, w_ref, b_ref, o_ref):
    o_ref[...] = (jnp.dot(x_ref[...], w_ref[...],
                          preferred_element_type=jnp.float32) + b_ref[...])


def pallas_linear(x, w, b, *, block_rows=256):
    """x: (M, Din), w: (Din, Dout), b: (Dout,) -> (M, Dout) float32."""
    m, d_in = x.shape
    d_out = w.shape[1]
    bm = m if m <= block_rows else block_rows
    grid = (pl.cdiv(m, bm),)
    b2 = b.reshape(1, d_out).astype(jnp.float32)
    return pl.pallas_call(
        _linear_kernel,
        out_shape=jax.ShapeDtypeStruct((m, d_out), jnp.float32),
        grid=grid,
        in_specs=[
            pl.BlockSpec((bm, d_in), lambda i: (i, 0)),
            pl.BlockSpec((d_in, d_out), lambda i: (0, 0)),
            pl.BlockSpec((1, d_out), lambda i: (0, 0)),
        ],
        out_specs=pl.BlockSpec((bm, d_out), lambda i: (i, 0)),
        compiler_params=pltpu.CompilerParams(dimension_semantics=("parallel",)),
    )(x.astype(jnp.float32), w.astype(jnp.float32), b2)


# ----------------------------------------------------------------------------
# Pallas kernel: fused grouped rel-pos attention, all heads for one batch elem
# ----------------------------------------------------------------------------
def _grouped_relpos_attn_kernel(
    xlen_ref,            # SMEM (B,) int32   (scalar prefetch)
    q_ref,               # (Tg, G*D)   (batch dim squeezed by BlockSpec)
    k_ref,               # (Tg, G*D)
    v_ref,               # (Tg, G*D)
    e_ref,               # (Trel, G*D)       batch-independent rel-pos projections
    u_ref,               # (1, G*D)          content bias (grouped)
    vbias_ref,           # (1, G*D)          position bias (grouped)
    o_ref,               # (Tg, G*D)
    w_ref,               # (H, Tg, Tg)
    *, num_heads, dim_head, group_size, scale):
    b = pl.program_id(0)
    tg = q_ref.shape[0]
    trel = e_ref.shape[0]

    q = q_ref[...]
    k = k_ref[...]
    v = v_ref[...]
    e = e_ref[...]
    u = u_ref[...]
    vb = vbias_ref[...]

    # shared across heads ----------------------------------------------------
    row = lax.broadcasted_iota(jnp.int32, (tg, tg), 0)
    col = lax.broadcasted_iota(jnp.int32, (tg, tg), 1)
    # relative -> absolute skew: abs[i, j] = rel[i, j - i + Tg - 1]
    diag = col - row + (tg - 1)                    # in [0, Trel)
    diag_masks = [diag == r for r in range(trel)]
    # fused key-padding mask (PaddingMask + pad(value=1) + ::group_size subsample):
    # group j is padding iff j * group_size >= x_len[b]
    xlen_b = xlen_ref[b]
    pad_bias = jnp.where(col * group_size >= xlen_b,
                         jnp.float32(-1e9), jnp.float32(0.0))

    dn = (((1,), (1,)), ((), ()))                  # contract dh with dh
    for h in range(num_heads):
        sl = slice(h * dim_head, (h + 1) * dim_head)
        qh, kh, vh, eh = q[:, sl], k[:, sl], v[:, sl], e[:, sl]
        # Qu = Q + u, Qv = Q + v fused (single Q stream from HBM)
        qu = qh + u[:, sl]
        qv = qh + vb[:, sl]

        scores_k = lax.dot_general(qu, kh, dn,
                                   preferred_element_type=jnp.float32)   # (Tg,Tg)
        rel = lax.dot_general(qv, eh, dn,
                              preferred_element_type=jnp.float32)        # (Tg,Trel)

        scores_e = jnp.zeros((tg, tg), jnp.float32)
        # TODO(synk): for large Tg replace this unrolled diagonal gather with a
        #             strided pltpu.roll (per-sublane shift) + slice.
        for r in range(trel):
            scores_e = scores_e + jnp.where(diag_masks[r], rel[:, r:r + 1], 0.0)

        scores = (scores_k + scores_e) * scale + pad_bias

        # softmax in f32
        m = jnp.max(scores, axis=-1, keepdims=True)
        p = jnp.exp(scores - m)
        denom = jnp.sum(p, axis=-1, keepdims=True)
        att = p * pl.reciprocal(denom, approx=True)

        w_ref[h, :, :] = att
        o_ref[:, sl] = jnp.dot(att, vh, preferred_element_type=jnp.float32)


def grouped_relpos_attention(x_len, q_g, k_g, v_g, e_g, u_g, v_bias_g,
                             *, num_heads, group_size):
    b, tg, gd = q_g.shape
    trel = e_g.shape[0]
    dim_head = gd // num_heads
    scale = 1.0 / math.sqrt(dim_head)
    kernel = functools.partial(_grouped_relpos_attn_kernel,
                               num_heads=num_heads, dim_head=dim_head,
                               group_size=group_size, scale=scale)
    blk_bqg = pl.BlockSpec((None, tg, gd), lambda bi, xl: (bi, 0, 0))
    blk_e = pl.BlockSpec((trel, gd), lambda bi, xl: (0, 0))
    blk_uv = pl.BlockSpec((1, gd), lambda bi, xl: (0, 0))
    blk_w = pl.BlockSpec((None, num_heads, tg, tg), lambda bi, xl: (bi, 0, 0, 0))
    o_g, att_w = pl.pallas_call(
        kernel,
        out_shape=(jax.ShapeDtypeStruct((b, tg, gd), jnp.float32),
                   jax.ShapeDtypeStruct((b, num_heads, tg, tg), jnp.float32)),
        grid_spec=pltpu.PrefetchScalarGridSpec(
            num_scalar_prefetch=1,
            grid=(b,),
            in_specs=[blk_bqg, blk_bqg, blk_bqg, blk_e, blk_uv, blk_uv],
            out_specs=(blk_bqg, blk_w),
        ),
        compiler_params=pltpu.CompilerParams(
            dimension_semantics=("parallel",)),
    )(x_len, q_g, k_g, v_g, e_g, u_g, v_bias_g)
    return o_g, att_w


# ----------------------------------------------------------------------------
# Grouped relative sinusoidal positional encoding (constant table, plain JAX)
# ----------------------------------------------------------------------------
def grouped_rel_pos_encoding_table(max_len, dim_model, group_size):
    g = group_size
    pos_left = jnp.arange(max_len - 1, g % 2 - 1, -1, dtype=jnp.float32)
    pos_right = jnp.arange(0, -max_len, -1, dtype=jnp.float32)
    pos = jnp.concatenate([pos_left, pos_right], axis=0)[:, None]
    denom = 10000.0 ** (2.0 * jnp.arange(0, dim_model // 2,
                                         dtype=jnp.float32)[None, :] / dim_model)
    angles = pos / denom
    pe = jnp.zeros((2 * max_len - g % 2, dim_model), jnp.float32)
    pe = pe.at[:, 0::2].set(jnp.sin(angles))
    pe = pe.at[:, 1::2].set(jnp.cos(angles))
    return pe


# ----------------------------------------------------------------------------
# Module forward (self-attention, hidden=None, causal=False)
# ----------------------------------------------------------------------------
def grouped_relpos_mhsa_forward(params, Q, K, V, x_len=None, *,
                                num_heads, group_size, max_pos_encoding):
    B, T, D = Q.shape
    G, H = group_size, num_heads
    assert (G * D) % H == 0
    dh = G * D // H

    # Q/K/V projections (fused into one Pallas matmul in the self-attention case)
    if (Q is K) and (Q is V):
        wqkv = jnp.concatenate([params["wq"], params["wk"], params["wv"]], axis=1)
        bqkv = jnp.concatenate([params["bq"], params["bk"], params["bv"]], axis=0)
        qkv = pallas_linear(Q.reshape(B * T, D), wqkv, bqkv).reshape(B, T, 3 * D)
        Qp, Kp, Vp = qkv[..., :D], qkv[..., D:2 * D], qkv[..., 2 * D:]
    else:
        Qp = pallas_linear(Q.reshape(B * T, D), params["wq"], params["bq"]).reshape(B, T, D)
        Kp = pallas_linear(K.reshape(B * T, D), params["wk"], params["bk"]).reshape(B, T, D)
        Vp = pallas_linear(V.reshape(B * T, D), params["wv"], params["bv"]).reshape(B, T, D)

    hidden = {"K": Kp, "V": Vp}

    # pad to a multiple of group_size (MultiHeadAttention.pad, zeros)
    overflow = T % G
    padding = (G - overflow) if overflow else 0
    T_pad = T + padding
    pad_cfg = ((0, 0), (0, padding), (0, 0))
    Qp, Kp, Vp = (jnp.pad(a, pad_cfg) for a in (Qp, Kp, Vp))

    # effective key lengths: fuses PaddingMask + pad(value=1) + ::group_size subsample
    if x_len is None:
        x_len_eff = jnp.full((B,), T, dtype=jnp.int32)
    else:
        x_len_eff = jnp.asarray(x_len, jnp.int32)

    # relative positional encodings -> pos_layer projection (Pallas matmul)
    pe = grouped_rel_pos_encoding_table(max_pos_encoding, D, G)
    r_start = max_pos_encoding - T_pad + G // 2
    r_end = max_pos_encoding - (G % 2) + T_pad - G // 2
    R = pe[r_start:r_end]                                   # (2*T_pad - G, D)
    E = pallas_linear(R, params["wp"], params["bp"])        # (2*T_pad - G, D)

    Tg = T_pad // G
    Trel = (2 * T_pad - G) // G                             # = 2*Tg - 1
    GD = G * D

    # grouped layout: contiguous reshapes only (no transposes); head h occupies
    # columns [h*dh, (h+1)*dh) of the grouped feature axis
    q_g = Qp.reshape(B, Tg, GD)
    k_g = Kp.reshape(B, Tg, GD)
    v_g = Vp.reshape(B, Tg, GD)
    e_g = E.reshape(Trel, GD)
    u_g = jnp.tile(params["u"], (G,)).reshape(1, GD).astype(jnp.float32)
    v_bias_g = jnp.tile(params["v"], (G,)).reshape(1, GD).astype(jnp.float32)

    o_g, att_w = grouped_relpos_attention(
        x_len_eff, q_g, k_g, v_g, e_g, u_g, v_bias_g,
        num_heads=H, group_size=G)

    O = o_g.reshape(B, T_pad, D)[:, :T, :]
    O = pallas_linear(O.reshape(B * T, D), params["wo"], params["bo"]).reshape(B, T, D)
    return O, att_w, hidden


# ----------------------------------------------------------------------------
# Pure-JAX reference mirroring the PyTorch module (for verification)
# ----------------------------------------------------------------------------
def reference_forward(params, Q, K, V, x_len, *, num_heads, group_size,
                      max_pos_encoding):
    B, T, D = Q.shape
    G, H = group_size, num_heads
    dh = G * D // H
    Qp = Q @ params["wq"] + params["bq"]
    Kp = K @ params["wk"] + params["bk"]
    Vp = V @ params["wv"] + params["bv"]
    hidden = {"K": Kp, "V": Vp}

    overflow = T % G
    padding = (G - overflow) if overflow else 0
    T_pad = T + padding
    pad_cfg = ((0, 0), (0, padding), (0, 0))
    Qp, Kp, Vp = (jnp.pad(a, pad_cfg) for a in (Qp, Kp, Vp))

    if x_len is not None:
        mask = (jnp.arange(T)[None, :] >= x_len[:, None]).astype(jnp.float32)
        mask = mask[:, None, None, :]
        mask = jnp.pad(mask, ((0, 0), (0, 0), (0, 0), (0, padding)), constant_values=1.0)
    elif padding:
        mask = jnp.pad(jnp.zeros((B, 1, 1, T), jnp.float32),
                       ((0, 0), (0, 0), (0, 0), (0, padding)), constant_values=1.0)
    else:
        mask = None

    Qu = Qp + params["u"]
    Qv = Qp + params["v"]
    pe = grouped_rel_pos_encoding_table(max_pos_encoding, D, G)
    R = pe[max_pos_encoding - T_pad + G // 2:
           max_pos_encoding - (G % 2) + T_pad - G // 2]
    E = R @ params["wp"] + params["bp"]
    E = jnp.broadcast_to(E[None], (B,) + E.shape)

    def heads(xx):
        return xx.reshape(B, -1, H, dh).transpose(0, 2, 1, 3)

    Qu, Qv, Kh, Vh, Eh = heads(Qu), heads(Qv), heads(Kp), heads(Vp), heads(E)
    scores_K = jnp.einsum("bhid,bhjd->bhij", Qu, Kh)
    rel = jnp.einsum("bhid,bhrd->bhir", Qv, Eh)

    # rel_to_abs, non-causal (as in PyTorch)
    b_, h_, t1, t2 = rel.shape
    tmp = jnp.pad(rel, ((0, 0), (0, 0), (0, 0), (0, 1)))
    tmp = tmp.reshape(b_, h_, -1)
    tmp = jnp.pad(tmp, ((0, 0), (0, 0), (0, t2 - t1)))
    tmp = tmp.reshape(b_, h_, 1 + t1, t2)
    scores_E = tmp[:, :, :t1, t1 - 1:]

    scores = (scores_K + scores_E) / (dh ** 0.5)
    if mask is not None:
        m = mask[:, :, ::G, ::G]
        scores = scores + m * (-1e9)
    att = jax.nn.softmax(scores, axis=-1)
    O = jnp.einsum("bhij,bhjd->bhid", att, Vh)
    O = O.transpose(0, 2, 1, 3).reshape(B, T_pad, D)
    O = O[:, :T]
    O = O @ params["wo"] + params["bo"]
    return O, att, hidden


# ----------------------------------------------------------------------------
if __name__ == "__main__":
    key = jax.random.PRNGKey(0)
    B, T, D = 2, 13, 32          # T=13 exercises the group padding path
    H, G = 4, 2                  # dim_head = G*D/H = 16
    MAX_POS = 32
    keys = jax.random.split(key, 14)

    def w_init(k, shape):
        return (jax.random.normal(k, shape, jnp.float32) / jnp.sqrt(shape[0]))

    params = {
        "wq": w_init(keys[0], (D, D)), "bq": 0.01 * jax.random.normal(keys[1], (D,)),
        "wk": w_init(keys[2], (D, D)), "bk": 0.01 * jax.random.normal(keys[3], (D,)),
        "wv": w_init(keys[4], (D, D)), "bv": 0.01 * jax.random.normal(keys[5], (D,)),
        "wp": w_init(keys[6], (D, D)), "bp": 0.01 * jax.random.normal(keys[7], (D,)),
        "wo": w_init(keys[8], (D, D)), "bo": 0.01 * jax.random.normal(keys[9], (D,)),
        "u": 0.1 * jax.random.normal(keys[10], (D,)),
        "v": 0.1 * jax.random.normal(keys[11], (D,)),
    }
    x = jax.random.normal(keys[12], (B, T, D), jnp.float32)
    x_len = jnp.array([13, 9], dtype=jnp.int32)

    O, att_w, hidden = grouped_relpos_mhsa_forward(
        params, x, x, x, x_len,
        num_heads=H, group_size=G, max_pos_encoding=MAX_POS)
    O = jax.block_until_ready(O)

    O_ref, att_ref, hid_ref = reference_forward(
        params, x, x, x, x_len,
        num_heads=H, group_size=G, max_pos_encoding=MAX_POS)

    Tg = (T + (G - T % G) % G) // G
    assert O.shape == (B, T, D)
    assert att_w.shape == (B, H, Tg, Tg)
    assert hidden["K"].shape == (B, T, D) and hidden["V"].shape == (B, T, D)
    assert bool(jnp.all(jnp.isfinite(O)))
    assert bool(jnp.allclose(O, O_ref, atol=2e-2, rtol=2e-2))
    assert bool(jnp.allclose(att_w, att_ref, atol=2e-2, rtol=2e-2))
    assert bool(jnp.allclose(hidden["K"], hid_ref["K"], atol=2e-2, rtol=2e-2))
    assert bool(jnp.allclose(hidden["V"], hid_ref["V"], atol=2e-2, rtol=2e-2))

    print("KERNEL_OK")
</pallas_src>

<mosaic_0001>
module attributes {stable_mosaic.version = 11 : i64} {
  func.func @_linear_kernel(%arg0: i32, %arg1: memref<26x32xf32, #tpu.memory_space<vmem>>, %arg2: memref<32x96xf32, #tpu.memory_space<vmem>>, %arg3: memref<1x96xf32, #tpu.memory_space<vmem>>, %arg4: memref<26x96xf32, #tpu.memory_space<vmem>>) attributes {dimension_semantics = [#tpu.dimension_semantics<parallel>], iteration_bounds = array<i64: 1>, scalar_prefetch = 0 : i64, scratch_operands = 0 : i64, tpu.core_type = #tpu.core_type<tc>, window_params = [{transform_indices = @transform_0, window_bounds = array<i64: 26, 32>}, {pipeline_mode = #tpu.pipeline_mode<synchronous>, transform_indices = @transform_1, window_bounds = array<i64: 32, 96>}, {pipeline_mode = #tpu.pipeline_mode<synchronous>, transform_indices = @transform_2, window_bounds = array<i64: 1, 96>}, {transform_indices = @transform_3, window_bounds = array<i64: 26, 96>}]} {
    %c0 = arith.constant 0 : index
    %c0_0 = arith.constant 0 : index
    %0 = vector.load %arg1[%c0, %c0_0] : memref<26x32xf32, #tpu.memory_space<vmem>>, vector<26x32xf32>
    %c0_1 = arith.constant 0 : index
    %c0_2 = arith.constant 0 : index
    %1 = vector.load %arg2[%c0_1, %c0_2] : memref<32x96xf32, #tpu.memory_space<vmem>>, vector<32x96xf32>
    %cst = arith.constant dense<0.000000e+00> : vector<26x96xf32>
    %2 = tpu.matmul %0, %1, %cst {dimension_numbers = #tpu.dot_dimension_numbers<[1], [0], [0], [1], [0, 0, 1, 1], [], []>, precision = #tpu.contract_precision<fp32>} : vector<26x32xf32>, vector<32x96xf32>, vector<26x96xf32> -> vector<26x96xf32>
    %c0_3 = arith.constant 0 : index
    %c0_4 = arith.constant 0 : index
    %3 = vector.load %arg3[%c0_3, %c0_4] : memref<1x96xf32, #tpu.memory_space<vmem>>, vector<1x96xf32>
    %4 = vector.broadcast %3 : vector<1x96xf32> to vector<26x96xf32>
    %5 = arith.addf %2, %4 : vector<26x96xf32>
    %c0_5 = arith.constant 0 : index
    %c0_6 = arith.constant 0 : index
    %6 = vector.load %arg4[%c0_5, %c0_6] : memref<26x96xf32, #tpu.memory_space<vmem>>, vector<26x96xf32>
    tpu.vector_store %arg4[%c0_5, %c0_6], %5 {strides = array<i32>} : memref<26x96xf32, #tpu.memory_space<vmem>>, vector<26x96xf32>,
    return
  }
  func.func @transform_0(%arg0: i32) -> (i32, i32) {
    %c0_i32 = arith.constant 0 : i32
    %c0_i32_0 = arith.constant 0 : i32
    return %arg0, %c0_i32 : i32, i32
  }
  func.func @transform_1(%arg0: i32) -> (i32, i32) {
    %c0_i32 = arith.constant 0 : i32
    %c0_i32_0 = arith.constant 0 : i32
    %c0_i32_1 = arith.constant 0 : i32
    return %c0_i32, %c0_i32_0 : i32, i32
  }
  func.func @transform_2(%arg0: i32) -> (i32, i32) {
    %c0_i32 = arith.constant 0 : i32
    %c0_i32_0 = arith.constant 0 : i32
    %c0_i32_1 = arith.constant 0 : i32
    return %c0_i32, %c0_i32_0 : i32, i32
  }
  func.func @transform_3(%arg0: i32) -> (i32, i32) {
    %c0_i32 = arith.constant 0 : i32
    %c0_i32_0 = arith.constant 0 : i32
    return %arg0, %c0_i32 : i32, i32
  }
}

</mosaic_0001>

<bundles_post_ra>
// kernel: tpu_custom_call.1
= control target key start
LH: loop header
LB: loop body
LE: loop exit
PB: predicated region body
PF: predicated region fallthrough
CT: control target
= control target key end

     0   :  { %8 = vsyncpa [#allocation3], 0  ;;  %s1131_s0 = inlined_call_operand.hbm [shape: f32[26,32], index: 0, kind: input, shape index: {}]   ;;  %s1132_s1 = inlined_call_operand.hbm [shape: f32[32,96], index: 1, kind: input, shape index: {}]   ;;  %s1133_s2 = inlined_call_operand.vmem [shape: f32[1,96], index: 2, kind: input, shape index: {}]   ;;  %s1134_s3 = inlined_call_operand.hbm [shape: f32[26,96], index: 3, kind: output, shape index: {}]  }
   0x1   :  { %9 = vsyncpa [#allocation6], 0 }
   0x2   :  { %10 = vsyncpa [#allocation4], 0  ;;  %s991_s12 = smov [#allocation2]   ;;  %s919_s16 = scalar_lea.hbm %s1131_s0, 512 }
   0x3   :  { %s16_s13 = sshll.u32 %s991_s12, 4  ;;  %p920_p0 = scmp.ne.s32.totalorder %s1131_s0, %s919_s16  ;;  %s17_s13 = int_to_ptr.vmem [resolvable:$true] %s16_s13 }
   0x4   :  { %p923_p1 = scmp.lt.u32.totalorder %s919_s16, %s1131_s0 }
   0x6   :  { %p925_p2 = pnand %p923_p1, %p920_p0 }
   0x8   :  { %928 = shalt.err (!%p925_p2)
}
   0x9   :  { %s929_s21 = scalar_lea.vmem %s17_s13, 512  ;;  %p934_p4 = scmp.lt.s32.totalorder %s17_s13, %s17_s13 }
   0xa   :  { %p930_p3 = scmp.ne.s32.totalorder %s17_s13, %s929_s21  ;;  %p935_p5 = scmp.lt.s32.totalorder %s929_s21, %s929_s21 }
   0xc   :  { %p936_p6 = por %p935_p5, %p934_p4 }
   0xe   :  { %p937_p7 = pnand %p936_p6, %p930_p3 }
  0x10   :  { %940 = shalt.err (!%p937_p7)
}
  0x11   :  { %s992_s22 = smov 128   ;;  %s993_s23 = smov 8  }
  0x12   :  { %22 = dma.hbm_to_vmem [thread:$0]  %s1131_s0, 512, %s17_s13, [#allocation3], %s992_s22, %s992_s22, %s993_s23  }
  0x13   :  { %s994_s26 = smov [#allocation5]   ;;  %s941_s30 = scalar_lea.hbm %s1132_s1, 512 }
  0x14   :  { %s28_s27 = sshll.u32 %s994_s26, 4  ;;  %p942_p8 = scmp.ne.s32.totalorder %s1132_s1, %s941_s30  ;;  %s29_s27 = int_to_ptr.vmem [resolvable:$true] %s28_s27 }
  0x15   :  { %p945_p9 = scmp.lt.u32.totalorder %s941_s30, %s1132_s1 }
  0x17   :  { %p947_p10 = pnand %p945_p9, %p942_p8 }
  0x19   :  { %950 = shalt.err (!%p947_p10)
}
  0x1a   :  { %s951_s8 = scalar_lea.vmem %s29_s27, 512  ;;  %p956_p12 = scmp.lt.s32.totalorder %s29_s27, %s29_s27 }
  0x1b   :  { %p952_p11 = scmp.ne.s32.totalorder %s29_s27, %s951_s8  ;;  %p957_p13 = scmp.lt.s32.totalorder %s951_s8, %s951_s8 }
  0x1d   :  { %p958_p0 = por %p957_p13, %p956_p12 }
  0x1f   :  { %p959_p1 = pnand %p958_p0, %p952_p11 }
  0x21   :  { %962 = shalt.err (!%p959_p1)
}
  0x22   :  { %34 = dma.hbm_to_vmem [thread:$0]  %s1132_s1, 512, %s29_s27, [#allocation6], %s992_s22, %s992_s22, %s993_s23  }
  0x23   :  { %985 = dma.done.wait [#allocation3], 512  }
  0x24   :  { %986 = vsyncadd [#allocation3], 4294966784 }
  0x25   :  { %987 = dma.done.wait [#allocation6], 512  }
  0x26   :  { %988 = vsyncadd [#allocation6], 4294966784  ;;  %vm58_vm0 = vcmask 261120   ;;  %v47_v0 = vld [vmem:[#allocation5] sm:$0xff]  ;;  %v48_v1 = vld [vmem:[#allocation5 + $0x8] sm:$0xff]  ;;  %vm685_vm1 = vcmask 785408  }
  0x27   :  { %v49_v2 = vld [vmem:[#allocation5 + $0x10] sm:$0xff]  ;;  %v72_v3 = vand.u32 4294901760, %v47_v0  ;;  %v75_v4 = vand.u32 4294901760, %v48_v1  ;;  %v50_v5 = vld [vmem:[#allocation5 + $0x18] sm:$0xff]  ;;  %v43_v7 = vld [vmem:[#allocation2] sm:$0xff]  ;;  %s995_s11 = smov [#allocation7]  }
  0x28   :  { %v78_v6 = vand.u32 4294901760, %v49_v2  ;;  %v44_v8 = vld [vmem:[#allocation2 + $0x8] sm:$0xff]  ;;  %v81_v9 = vand.u32 4294901760, %v50_v5  ;;  %v60_v10 = vsel %vm58_vm0, %v43_v7, 0  ;;  %v45_v12 = vld [vmem:[#allocation2 + $0x10] sm:$0xff]  ;;  %s696_s12 = sshll.u32 %s995_s11, 4  ;;  %s697_s12 = int_to_ptr.vmem [resolvable:$true] %s696_s12 }
  0x29   :  { %v63_v11 = vsel %vm58_vm0, %v44_v8, 0  ;;  %v46_v13 = vld [vmem:[#allocation2 + $0x18] sm:$0x3]  ;;  %v1048_v14 = vpack.c.bf16 %v75_v4, %v72_v3  ;;  %v1050_v15 = vand.u32 4294901760, %v60_v10  ;;  %v182_v17 = vsub.f32 %v47_v0, %v72_v3  ;;  %v709_v60 = vld [vmem:[%s1133_s2] ss:$0 sm:$0xff]  ;;  %p968_p3 = scmp.lt.s32.totalorder %s697_s12, %s697_s12 }
  0x2a   :  { %v1052_v16 = vand.u32 4294901760, %v63_v11  ;;  %v1054_v18 = vpack.c.bf16 %v81_v9, %v78_v6  ;;  %v189_v19 = vsub.f32 %v48_v1, %v75_v4  ;;  %v66_v20 = vsel %vm58_vm0, %v45_v12, 0  ;;  %s963_s2 = scalar_lea.vmem %s697_s12, 512 }
  0x2b   :  { %v69_v21 = vsel %vm58_vm0, %v46_v13, 0  ;;  %843 = vmatprep.subr.bf16.mxu1 %v1048_v14  ;;  %867 = vmatprep.subr.bf16.mxu0 %v1048_v14  ;;  %v1061_v22 = vsub.f32 %v60_v10, %v1050_v15  ;;  %v183_v24 = vand.u32 4294901760, %v182_v17  ;;  %v1066_v25 = vand.u32 4294901760, %v66_v20  ;;  %p964_p2 = scmp.ne.s32.totalorder %s697_s12, %s963_s2  ;;  %p969_p4 = scmp.lt.s32.totalorder %s963_s2, %s963_s2 }
  0x2c   :  { %v1064_v23 = vsub.f32 %v63_v11, %v1052_v16  ;;  %845 = vmatpush3.bf16.msra.mxu1 %v1048_v14  ;;  %869 = vmatpush3.bf16.msra.mxu0 %v1048_v14  ;;  %v190_v26 = vand.u32 4294901760, %v189_v19  ;;  %v1070_v27 = vand.u32 4294901760, %v69_v21  ;;  %v196_v28 = vsub.f32 %v49_v2, %v78_v6 }
  0x2d   :  { %v203_v29 = vsub.f32 %v50_v5, %v81_v9  ;;  %847 = vmatprep.subr.bf16.mxu1 %v1054_v18  ;;  %871 = vmatprep.subr.bf16.mxu0 %v1054_v18  ;;  %v142_v30 = vand.u32 4294901760, %v1061_v22  ;;  %v184_v32 = vsub.f32 %v182_v17, %v183_v24  ;;  %v1077_v33 = vsub.f32 %v66_v20, %v1066_v25  ;;  %p970_p5 = por %p969_p4, %p968_p3 }
  0x2e   :  { %v152_v31 = vand.u32 4294901760, %v1064_v23  ;;  %v191_v34 = vsub.f32 %v189_v19, %v190_v26  ;;  %v874_v35 = vpack.c.bf16 %v190_v26, %v183_v24  ;;  %v1080_v36 = vsub.f32 %v69_v21, %v1070_v27 }
  0x2f   :  { %v197_v37 = vand.u32 4294901760, %v196_v28  ;;  %v143_v38 = vsub.f32 %v1061_v22, %v142_v30  ;;  %808 = vmatprep.mubr.f32.mxu0 %v142_v30  ;;  %v185_v40 = vand.u32 4294901760, %v184_v32  ;;  %v162_v41 = vand.u32 4294901760, %v1077_v33  ;;  %p971_p6 = pnand %p970_p5, %p964_p2 }
  0x30   :  { %v153_v39 = vsub.f32 %v1064_v23, %v152_v31  ;;  %849 = vmatpush3.bf16.msra.mxu1 %v1054_v18  ;;  %873 = vmatpush3.bf16.msra.mxu0 %v1054_v18  ;;  %v192_v42 = vand.u32 4294901760, %v191_v34  ;;  %v172_v43 = vand.u32 4294901760, %v1080_v36  ;;  %v204_v45 = vand.u32 4294901760, %v203_v29 }
  0x31   :  { %v198_v44 = vsub.f32 %v196_v28, %v197_v37  ;;  %v144_v46 = vand.u32 4294901760, %v143_v38  ;;  %875 = vmatprep.subr.bf16.mxu0 %v874_v35  ;;  %v163_v48 = vsub.f32 %v1077_v33, %v162_v41  ;;  %v858_v58 = vpack.c.bf16 %v189_v19, %v182_v17 }
  0x32   :  { %v154_v47 = vand.u32 4294901760, %v153_v39  ;;  %v850_v49 = vpack.c.bf16 %v192_v42, %v185_v40  ;;  %v173_v50 = vsub.f32 %v1080_v36, %v172_v43  ;;  %v205_v52 = vsub.f32 %v203_v29, %v204_v45 }
  0x33   :  { %v199_v51 = vand.u32 4294901760, %v198_v44  ;;  %766 = vmatprep.mubr.f32.mxu1 %v144_v46  ;;  %809 = vmatmul.mubr.f32.vlgmr.msra.gmra.mrb[0].mxu0 %v152_v31  ;;  %v164_v53 = vand.u32 4294901760, %v163_v48  ;;  %v878_v54 = vpack.c.bf16 %v204_v45, %v197_v37  ;;  %v862_v59 = vpack.c.bf16 %v203_v29, %v196_v28 }
  0x34   :  { %767 = vmatmul.mubr.f32.vlgmr.msra.gmra.mrb[0].mxu1 %v154_v47  ;;  %851 = vmatprep.subr.bf16.mxu1 %v850_v49  ;;  %v174_v55 = vand.u32 4294901760, %v173_v50  ;;  %v206_v56 = vand.u32 4294901760, %v205_v52  ;;  %vm689_vm2 = vcmask 779264  }
  0x35   :  { %853 = vmatpush3.bf16.msra.mxu1 %v850_v49  ;;  %877 = vmatpush3.bf16.msra.mxu0 %v874_v35 }
  0x36   :  { %769 = vmatprep.mubr.f32.mxu1 %v164_v53  ;;  %811 = vmatprep.mubr.f32.mxu0 %v162_v41  ;;  %v854_v57 = vpack.c.bf16 %v206_v56, %v199_v51 }
  0x37   :  { %812 = vmatmul.mubr.f32.gmra.mrb[2].mxu0 %v172_v43  ;;  %879 = vmatprep.subr.bf16.mxu0 %v878_v54 }
  0x38   :  { %770 = vmatmul.mubr.f32.gmra.mrb[2].mxu1 %v174_v55  ;;  %855 = vmatprep.subr.bf16.mxu1 %v854_v57 }
  0x39   :  { %857 = vmatpush3.bf16.msra.mxu1 %v854_v57  ;;  %881 = vmatpush3.bf16.msra.mxu0 %v878_v54 }
  0x3a   :  { %780 = vmatprep.mubr.f32.mxu1 %v1050_v15  ;;  %822 = vmatprep.mubr.f32.mxu0 %v1050_v15 }
  0x3b   :  { %859 = vmatprep.subr.bf16.mxu1 %v858_v58  ;;  %883 = vmatprep.subr.bf16.mxu0 %v1048_v14 }
  0x3c   :  { %781 = vmatmul.mubr.f32.vlgmr.msra.gmra.mrb[0].mxu1 %v1052_v16  ;;  %823 = vmatmul.mubr.f32.vlgmr.msra.gmra.mrb[0].mxu0 %v1052_v16 }
  0x3d   :  { %861 = vmatpush3.bf16.msra.mxu1 %v858_v58  ;;  %885 = vmatpush3.bf16.msra.mxu0 %v1048_v14 }
  0x3e   :  { %783 = vmatprep.mubr.f32.mxu1 %v1066_v25  ;;  %825 = vmatprep.mubr.f32.mxu0 %v1066_v25 }
  0x3f   :  { %863 = vmatprep.subr.bf16.mxu1 %v862_v59  ;;  %887 = vmatprep.subr.bf16.mxu0 %v1054_v18 }
  0x40   :  { %784 = vmatmul.mubr.f32.gmra.mrb[2].mxu1 %v1070_v27  ;;  %826 = vmatmul.mubr.f32.gmra.mrb[2].mxu0 %v1070_v27 }
  0x41   :  { %865 = vmatpush3.bf16.msra.mxu1 %v862_v59  ;;  %889 = vmatpush3.bf16.msra.mxu0 %v1054_v18 }
  0x42   :  { %794 = vmatprep.mubr.f32.mxu1 %v1061_v22  ;;  %836 = vmatprep.mubr.f32.mxu0 %v1050_v15 }
  0x44   :  { %795 = vmatmul.mubr.f32.vlgmr.msra.gmra.mrb[0].mxu1 %v1064_v23  ;;  %837 = vmatmul.mubr.f32.vlgmr.msra.gmra.mrb[0].mxu0 %v1052_v16 }
  0x45   :  { %797 = vmatprep.mubr.f32.mxu1 %v1077_v33  ;;  %839 = vmatprep.mubr.f32.mxu0 %v1066_v25 }
  0x48   :  { %798 = vmatmul.mubr.f32.gmra.mrb[2].mxu1 %v1080_v36  ;;  %840 = vmatmul.mubr.f32.gmra.mrb[2].mxu0 %v1070_v27 }
 0x117   :  { %v796_v61 = vpop.f32.mrb[0].mxu1  ;;  %v838_v62 = vpop.f32.mrb[0].mxu0 }
 0x118   :  { %v890_v63 = vadd.f32 %v796_v61, %v709_v60  ;;  %v365_v0 = vpop.f32.mrb[1].mxu1  ;;  %v663_v1 = vpop.f32.mrb[1].mxu0 }
 0x119   :  { %v892_v2 = vadd.f32 %v709_v60, %v365_v0 }
 0x11a   :  { %v891_v3 = vadd.f32 %v890_v63, %v838_v62 }
 0x11b   :  { %v893_v4 = vadd.f32 %v892_v2, %v663_v1  ;;  %v799_v5 = vpop.f32.mrb[2].mxu1  ;;  %v841_v6 = vpop.f32.mrb[2].mxu0 }
 0x11c   :  { %687 = vst.msk [vmem:[#allocation7 + $0x8] sm:$0xff] %vm685_vm1, %v891_v3  ;;  %v894_v7 = vadd.f32 %v799_v5, %v709_v60  ;;  %v379_v8 = vpop.f32.mrb[3].mxu1  ;;  %v675_v9 = vpop.f32.mrb[3].mxu0 }
 0x11d   :  { %686 = vst.msk [vmem:[#allocation7] sm:$0xff] %vm685_vm1, %v893_v4  ;;  %v896_v10 = vadd.f32 %v709_v60, %v379_v8 }
 0x11e   :  { %v895_v11 = vadd.f32 %v894_v7, %v841_v6 }
 0x11f   :  { %v897_v12 = vadd.f32 %v896_v10, %v675_v9 }
 0x120   :  { %690 = vst.msk [vmem:[#allocation7 + $0x18] sm:$0x3] %vm689_vm2, %v895_v11 }
 0x121   :  { %688 = vst.msk [vmem:[#allocation7 + $0x10] sm:$0xff] %vm685_vm1, %v897_v12 }
 0x122   :  { %974 = shalt.err (!%p971_p6)
}
 0x123   :  { %s975_s15 = scalar_lea.hbm %s1134_s3, 512 }
 0x124   :  { %p976_p7 = scmp.ne.s32.totalorder %s1134_s3, %s975_s15  ;;  %p979_p8 = scmp.lt.u32.totalorder %s975_s15, %s1134_s3 }
 0x126   :  { %p981_p9 = pnand %p979_p8, %p976_p7 }
 0x128   :  { %984 = shalt.err (!%p981_p9)
}
 0x129   :  { %702 = dma.vmem_to_hbm [thread:$0]  %s697_s12, 512, %s1134_s3, [#allocation4], %s992_s22, %s992_s22, %s993_s23  }
 0x12a   :  { %989 = dma.done.wait [#allocation4], 512  }
 0x12b   :  { %990 = vsyncadd [#allocation4], 4294966784 }
 0x12c   :  { %706 = vsyncpa [#allocation3], 1 }
 0x12d   :  { %707 = vsyncpa [#allocation6], 1 }
 0x12e   :  { %708 = vsyncpa [#allocation4], 1 }

</bundles_post_ra>
